<compile_context>
chip_gen: v7x
topology: tpu7x:2x2x1
jax: 0.10.0
libtpu: 0.0.40
codegen_flags: <defaults>
</compile_context>

<pallas_src>
import functools

import jax
import jax.numpy as jnp
from jax import lax
from jax.experimental import pallas as pl
from jax.experimental.pallas import tpu as pltpu

BN_EPS = 1e-5


# --------------------------------------------------------------------------- helpers
def _swish_f32(y):
    # y * sigmoid(y) in f32; exp and reciprocal both land on the EUP.
    return y * pl.reciprocal(1.0 + jnp.exp(-y), approx=True)


def _row_tile(m, cap=2048):
    """Largest multiple-of-8 row tile dividing m (<= cap), preferring >= 2 grid
    steps so both TensorCores get work on megacore parts."""
    if m % 8 != 0:
        return m
    cands = [t for t in range(8, min(m, cap) + 1, 8) if m % t == 0]
    if not cands:
        return m
    multi = [t for t in cands if m // t >= 2]
    return max(multi) if multi else max(cands)


def _fold_bn(gamma, beta, mean, var):
    s = gamma / jnp.sqrt(var + BN_EPS)
    return s[None, :], (beta - mean * s)[None, :]


# --------------------------------------------------------------------------- K1: expand 1x1 conv + BN + Swish
def _expand_kernel(x_ref, w_ref, s_ref, b_ref, o_ref):
    acc = jnp.dot(x_ref[...].astype(jnp.float32), w_ref[...].astype(jnp.float32),
                  preferred_element_type=jnp.float32)
    y = acc * s_ref[...] + b_ref[...]
    o_ref[...] = _swish_f32(y).astype(o_ref.dtype)


def expand_conv_bn_swish(x_mat, w_mat, scale, bias):
    m, cin = x_mat.shape
    chid = w_mat.shape[1]
    tm = _row_tile(m)
    return pl.pallas_call(
        _expand_kernel,
        out_shape=jax.ShapeDtypeStruct((m, chid), x_mat.dtype),
        grid_spec=pltpu.PrefetchScalarGridSpec(
            num_scalar_prefetch=0,
            grid=(m // tm,),
            in_specs=[
                pl.BlockSpec((tm, cin), lambda i: (i, 0)),
                pl.BlockSpec((cin, chid), lambda i: (0, 0)),
                pl.BlockSpec((1, chid), lambda i: (0, 0)),
                pl.BlockSpec((1, chid), lambda i: (0, 0)),
            ],
            out_specs=pl.BlockSpec((tm, chid), lambda i: (i, 0)),
        ),
        compiler_params=pltpu.CompilerParams(dimension_semantics=("parallel",)),
    )(x_mat, w_mat, scale, bias)


# --------------------------------------------------------------------------- K2: depthwise conv + BN + Swish (+ SE squeeze)
def _dw_kernel(x_ref, w_ref, s_ref, b_ref, y_ref, p_ref, *, k, stride, ho, wo):
    x = x_ref[...].astype(jnp.float32)          # (Hs, Ws, C)
    w = w_ref[...].astype(jnp.float32)          # (k, k, C)
    c = x.shape[-1]
    acc = jnp.zeros((ho, wo, c), jnp.float32)
    for kh in range(k):                          # static unroll: k*k taps
        for kw in range(k):
            tap = x[kh:kh + stride * ho, kw:kw + stride * wo, :]
            if stride > 1:
                tap = tap.reshape(ho, stride, wo, stride, c)[:, 0, :, 0, :]
            acc = acc + tap * w[kh, kw, :]
    y = acc * s_ref[...] + b_ref[...]            # folded BN, per-channel
    y = _swish_f32(y)
    y_ref[...] = y.astype(y_ref.dtype)
    # SE squeeze (global average pool) for free in the epilogue.
    p_ref[...] = jnp.mean(y.reshape(ho * wo, c), axis=0, keepdims=True).astype(p_ref.dtype)


def depthwise_conv_bn_swish_pool(x_nhwc, w_kkc, scale, bias, *, k, stride):
    n, h, w, c = x_nhwc.shape
    p = max(k - stride, 0)
    hp, wp = h + p, w + p
    ho = (hp - k) // stride + 1
    wo = (wp - k) // stride + 1
    hs = (k - 1) + stride * ho                  # slice-safe padded extent
    ws = (k - 1) + stride * wo
    # TODO(synk): conv zero-padding done once in the wrapper (small halo copy);
    # could be folded into the kernel with masked edge handling.
    x_pad = jnp.pad(
        x_nhwc,
        ((0, 0),
         (p // 2, (p - p // 2) + (hs - hp)),
         (p // 2, (p - p // 2) + (ws - wp)),
         (0, 0)))
    kern = functools.partial(_dw_kernel, k=k, stride=stride, ho=ho, wo=wo)
    y, pooled = pl.pallas_call(
        kern,
        out_shape=(jax.ShapeDtypeStruct((n, ho, wo, c), x_nhwc.dtype),
                   jax.ShapeDtypeStruct((n, 1, c), jnp.float32)),
        grid_spec=pltpu.PrefetchScalarGridSpec(
            num_scalar_prefetch=0,
            grid=(n,),
            in_specs=[
                pl.BlockSpec((None, hs, ws, c), lambda i: (i, 0, 0, 0)),
                pl.BlockSpec((k, k, c), lambda i: (0, 0, 0)),
                pl.BlockSpec((1, c), lambda i: (0, 0)),
                pl.BlockSpec((1, c), lambda i: (0, 0)),
            ],
            out_specs=[
                pl.BlockSpec((None, ho, wo, c), lambda i: (i, 0, 0, 0)),
                pl.BlockSpec((None, 1, c), lambda i: (i, 0, 0)),
            ],
        ),
        compiler_params=pltpu.CompilerParams(dimension_semantics=("parallel",)),
    )(x_pad, w_kkc, scale, bias)
    return y, pooled[:, 0, :]                   # pooled -> (N, C)


# --------------------------------------------------------------------------- K3: squeeze-excite gate (tiny)
def _se_gate_kernel(p_ref, w1_ref, b1_ref, w2_ref, b2_ref, o_ref):
    p = p_ref[...].astype(jnp.float32)          # (N, C)
    w1 = w1_ref[...].astype(jnp.float32)        # (Cr, C)  torch (out, in) layout
    w2 = w2_ref[...].astype(jnp.float32)        # (C, Cr)
    # FC1 + Swish: h[n, r] = sum_c p[n, c] * w1[r, c] + b1[r]   (lane reduction)
    h = jnp.sum(p[:, None, :] * w1[None, :, :], axis=-1) + b1_ref[...]
    h = h * (1.0 / (1.0 + jnp.exp(-h)))         # exact swish (tiny tensor)
    # FC2 + sigmoid: g[n, c] = sum_r h[n, r] * w2[c, r] + b2[c]
    g = jnp.sum(h[:, None, :] * w2[None, :, :], axis=-1) + b2_ref[...]
    o_ref[...] = (1.0 / (1.0 + jnp.exp(-g))).astype(o_ref.dtype)


def se_gate(pooled, w1, b1, w2, b2):
    n, c = pooled.shape
    cr = w1.shape[0]
    return pl.pallas_call(
        _se_gate_kernel,
        out_shape=jax.ShapeDtypeStruct((n, c), jnp.float32),
        grid_spec=pltpu.PrefetchScalarGridSpec(
            num_scalar_prefetch=0,
            grid=(1,),
            in_specs=[
                pl.BlockSpec((n, c), lambda i: (0, 0)),
                pl.BlockSpec((cr, c), lambda i: (0, 0)),
                pl.BlockSpec((1, cr), lambda i: (0, 0)),
                pl.BlockSpec((c, cr), lambda i: (0, 0)),
                pl.BlockSpec((1, c), lambda i: (0, 0)),
            ],
            out_specs=pl.BlockSpec((n, c), lambda i: (0, 0)),
        ),
        compiler_params=pltpu.CompilerParams(dimension_semantics=("arbitrary",)),
    )(pooled, w1, b1, w2, b2)


# --------------------------------------------------------------------------- K4: SE gating + project 1x1 conv + BN (+ residual)
def _proj_res_kernel(x_ref, g_ref, w_ref, s_ref, b_ref, r_ref, o_ref):
    x = x_ref[...].astype(jnp.float32)          # (tm, Chid)
    g = g_ref[...].astype(jnp.float32)          # (1, Chid) per-batch SE gate
    acc = jnp.dot(x * g, w_ref[...].astype(jnp.float32),
                  preferred_element_type=jnp.float32)
    y = acc * s_ref[...] + b_ref[...] + r_ref[...].astype(jnp.float32)
    o_ref[...] = y.astype(o_ref.dtype)


def _proj_kernel(x_ref, g_ref, w_ref, s_ref, b_ref, o_ref):
    x = x_ref[...].astype(jnp.float32)
    g = g_ref[...].astype(jnp.float32)
    acc = jnp.dot(x * g, w_ref[...].astype(jnp.float32),
                  preferred_element_type=jnp.float32)
    o_ref[...] = (acc * s_ref[...] + b_ref[...]).astype(o_ref.dtype)


def se_scale_project_bn(x_nmc, gate_n1c, w_mat, scale, bias, residual_nmc=None):
    n, mh, chid = x_nmc.shape
    cout = w_mat.shape[1]
    tm = _row_tile(mh)
    grid = (n, mh // tm)
    x_spec = pl.BlockSpec((None, tm, chid), lambda i, j: (i, j, 0))
    g_spec = pl.BlockSpec((None, 1, chid), lambda i, j: (i, 0, 0))
    w_spec = pl.BlockSpec((chid, cout), lambda i, j: (0, 0))
    v_spec = pl.BlockSpec((1, cout), lambda i, j: (0, 0))
    o_spec = pl.BlockSpec((None, tm, cout), lambda i, j: (i, j, 0))
    if residual_nmc is None:
        kern = _proj_kernel
        in_specs = [x_spec, g_spec, w_spec, v_spec, v_spec]
        args = (x_nmc, gate_n1c, w_mat, scale, bias)
    else:
        kern = _proj_res_kernel
        r_spec = pl.BlockSpec((None, tm, cout), lambda i, j: (i, j, 0))
        in_specs = [x_spec, g_spec, w_spec, v_spec, v_spec, r_spec]
        args = (x_nmc, gate_n1c, w_mat, scale, bias, residual_nmc)
    return pl.pallas_call(
        kern,
        out_shape=jax.ShapeDtypeStruct((n, mh, cout), x_nmc.dtype),
        grid_spec=pltpu.PrefetchScalarGridSpec(
            num_scalar_prefetch=0, grid=grid, in_specs=in_specs, out_specs=o_spec),
        compiler_params=pltpu.CompilerParams(
            dimension_semantics=("parallel", "parallel")),
    )(*args)


# --------------------------------------------------------------------------- full MBConv forward
def mbconv_forward(x_nchw, params, *, expand_ratio, kernel_size, stride):
    n, cin, h, w = x_nchw.shape
    cout = params["w_proj"].shape[0]
    use_residual = (cin == cout) and (stride == 1)

    x_nhwc = jnp.transpose(x_nchw, (0, 2, 3, 1))          # layout plumbing (once)

    # 1) expand 1x1 conv + BN + Swish
    if expand_ratio != 1:
        s1, b1 = _fold_bn(*params["bn1"])
        chid = params["w_exp"].shape[0]
        h1 = expand_conv_bn_swish(
            x_nhwc.reshape(n * h * w, cin),                # free reshape
            jnp.transpose(params["w_exp"], (1, 0)),        # (Cin, Chid)
            s1, b1).reshape(n, h, w, chid)
    else:
        chid = cin
        h1 = x_nhwc

    # 2) depthwise conv + BN + Swish (+ fused SE squeeze)
    s2, b2 = _fold_bn(*params["bn2"])
    w_dw = jnp.transpose(params["w_dw"], (1, 2, 0))        # (k, k, Chid)
    h2, pooled = depthwise_conv_bn_swish_pool(h1, w_dw, s2, b2,
                                              k=kernel_size, stride=stride)
    _, ho, wo, _ = h2.shape

    # 3) squeeze-excite gate on the pooled (N, Chid) tensor
    gate = se_gate(pooled,
                   params["w_se1"], params["b_se1"][None, :],
                   params["w_se2"], params["b_se2"][None, :])   # (N, Chid)

    # 4) SE gating + project 1x1 conv + BN (+ residual), fused
    s3, b3 = _fold_bn(*params["bn3"])
    res = x_nhwc.reshape(n, ho * wo, cout) if use_residual else None
    # TODO(synk): drop_connect is training-only stochastic depth; this implements
    # the deterministic eval-mode forward (identity on the residual branch).
    out = se_scale_project_bn(
        h2.reshape(n, ho * wo, chid),
        gate.reshape(n, 1, chid),
        jnp.transpose(params["w_proj"], (1, 0)),           # (Chid, Cout)
        s3, b3, residual_nmc=res)
    return jnp.transpose(out.reshape(n, ho, wo, cout), (0, 3, 1, 2))


# --------------------------------------------------------------------------- params + pure-JAX reference
def init_params(key, cin, cout, expand_ratio, kernel_size, reduction_ratio=4):
    chid = cin * expand_ratio
    cr = max(1, cin // reduction_ratio)
    ks = jax.random.split(key, 10)

    def bn_params(k, c):
        k1, k2, k3, k4 = jax.random.split(k, 4)
        return (1.0 + 0.2 * jax.random.normal(k1, (c,), jnp.float32),   # gamma
                0.1 * jax.random.normal(k2, (c,), jnp.float32),         # beta
                0.1 * jax.random.normal(k3, (c,), jnp.float32),         # running_mean
                0.8 + 0.4 * jax.random.uniform(k4, (c,), jnp.float32))  # running_var

    p = {}
    if expand_ratio != 1:
        p["w_exp"] = 0.25 * jax.random.normal(ks[0], (chid, cin), jnp.float32)
        p["bn1"] = bn_params(ks[1], chid)
    p["w_dw"] = 0.25 * jax.random.normal(ks[2], (chid, kernel_size, kernel_size), jnp.float32)
    p["bn2"] = bn_params(ks[3], chid)
    p["w_se1"] = 0.25 * jax.random.normal(ks[4], (cr, chid), jnp.float32)
    p["b_se1"] = 0.1 * jax.random.normal(ks[5], (cr,), jnp.float32)
    p["w_se2"] = 0.25 * jax.random.normal(ks[6], (chid, cr), jnp.float32)
    p["b_se2"] = 0.1 * jax.random.normal(ks[7], (chid,), jnp.float32)
    p["w_proj"] = 0.25 * jax.random.normal(ks[8], (cout, chid), jnp.float32)
    p["bn3"] = bn_params(ks[9], cout)
    return p


def mbconv_reference(x_nchw, params, *, expand_ratio, kernel_size, stride):
    n, cin, h, w = x_nchw.shape
    cout = params["w_proj"].shape[0]
    use_residual = (cin == cout) and (stride == 1)

    def bn(t, gbmv):
        g, b, m, v = gbmv
        return (t - m) / jnp.sqrt(v + BN_EPS) * g + b

    def swish(t):
        return t * jax.nn.sigmoid(t)

    x = jnp.transpose(x_nchw, (0, 2, 3, 1)).astype(jnp.float32)
    hcur = x
    if expand_ratio != 1:
        hcur = jnp.einsum("nhwc,oc->nhwo", hcur, params["w_exp"])
        hcur = swish(bn(hcur, params["bn1"]))
    chid = hcur.shape[-1]
    k, s = kernel_size, stride
    p = max(k - s, 0)
    hp = jnp.pad(hcur, ((0, 0), (p // 2, p - p // 2), (p // 2, p - p // 2), (0, 0)))
    rhs = jnp.transpose(params["w_dw"], (1, 2, 0)).reshape(k, k, 1, chid)
    hcur = lax.conv_general_dilated(hp, rhs, window_strides=(s, s), padding="VALID",
                                    dimension_numbers=("NHWC", "HWIO", "NHWC"),
                                    feature_group_count=chid)
    hcur = swish(bn(hcur, params["bn2"]))
    pooled = jnp.mean(hcur, axis=(1, 2))
    z = swish(pooled @ params["w_se1"].T + params["b_se1"])
    gate = jax.nn.sigmoid(z @ params["w_se2"].T + params["b_se2"])
    hcur = hcur * gate[:, None, None, :]
    hcur = bn(jnp.einsum("nhwc,oc->nhwo", hcur, params["w_proj"]), params["bn3"])
    if use_residual:
        hcur = hcur + x
    return jnp.transpose(hcur, (0, 3, 1, 2))


if __name__ == "__main__":
    key = jax.random.PRNGKey(0)
    k_x, k_p = jax.random.split(key)

    # Small NCHW input (PyTorch layout). in==out and stride=1 -> residual path.
    N, C_IN, H, W = 2, 32, 16, 16
    C_OUT, EXPAND, KSIZE, STRIDE = 32, 4, 3, 1

    x = jax.random.normal(k_x, (N, C_IN, H, W), dtype=jnp.float32)
    params = init_params(k_p, C_IN, C_OUT, EXPAND, KSIZE)

    y = mbconv_forward(x, params, expand_ratio=EXPAND, kernel_size=KSIZE, stride=STRIDE)
    y = jax.block_until_ready(y)

    y_ref = mbconv_reference(x, params, expand_ratio=EXPAND, kernel_size=KSIZE, stride=STRIDE)

    assert y.shape == y_ref.shape == (N, C_OUT, H, W)
    # approx EUP reciprocal in the fused Swish epilogues -> ~bf16-level relative error
    assert jnp.allclose(y, y_ref, atol=2e-2, rtol=2e-2), float(jnp.max(jnp.abs(y - y_ref)))

    print("KERNEL_OK")
</pallas_src>

<mosaic_0001>
module attributes {stable_mosaic.version = 11 : i64} {
  func.func @_expand_kernel(%arg0: i32, %arg1: memref<256x32xf32, #tpu.memory_space<vmem>>, %arg2: memref<32x128xf32, #tpu.memory_space<vmem>>, %arg3: memref<1x128xf32, #tpu.memory_space<vmem>>, %arg4: memref<1x128xf32, #tpu.memory_space<vmem>>, %arg5: memref<256x128xf32, #tpu.memory_space<vmem>>) attributes {dimension_semantics = [#tpu.dimension_semantics<parallel>], iteration_bounds = array<i64: 2>, scalar_prefetch = 0 : i64, scratch_operands = 0 : i64, tpu.core_type = #tpu.core_type<tc>, window_params = [{transform_indices = @transform_0, window_bounds = array<i64: 256, 32>}, {pipeline_mode = #tpu.pipeline_mode<synchronous>, transform_indices = @transform_1, window_bounds = array<i64: 32, 128>}, {pipeline_mode = #tpu.pipeline_mode<synchronous>, transform_indices = @transform_2, window_bounds = array<i64: 1, 128>}, {pipeline_mode = #tpu.pipeline_mode<synchronous>, transform_indices = @transform_3, window_bounds = array<i64: 1, 128>}, {transform_indices = @transform_4, window_bounds = array<i64: 256, 128>}]} {
    %c0 = arith.constant 0 : index
    %c0_0 = arith.constant 0 : index
    %0 = vector.load %arg1[%c0, %c0_0] : memref<256x32xf32, #tpu.memory_space<vmem>>, vector<256x32xf32>
    %c0_1 = arith.constant 0 : index
    %c0_2 = arith.constant 0 : index
    %1 = vector.load %arg2[%c0_1, %c0_2] : memref<32x128xf32, #tpu.memory_space<vmem>>, vector<32x128xf32>
    %cst = arith.constant dense<0.000000e+00> : vector<256x128xf32>
    %2 = tpu.matmul %0, %1, %cst {dimension_numbers = #tpu.dot_dimension_numbers<[1], [0], [0], [1], [0, 0, 1, 1], [], []>} : vector<256x32xf32>, vector<32x128xf32>, vector<256x128xf32> -> vector<256x128xf32>
    %c0_3 = arith.constant 0 : index
    %c0_4 = arith.constant 0 : index
    %3 = vector.load %arg3[%c0_3, %c0_4] : memref<1x128xf32, #tpu.memory_space<vmem>>, vector<1x128xf32>
    %4 = vector.broadcast %3 : vector<1x128xf32> to vector<256x128xf32>
    %5 = arith.mulf %2, %4 : vector<256x128xf32>
    %c0_5 = arith.constant 0 : index
    %c0_6 = arith.constant 0 : index
    %6 = vector.load %arg4[%c0_5, %c0_6] : memref<1x128xf32, #tpu.memory_space<vmem>>, vector<1x128xf32>
    %7 = vector.broadcast %6 : vector<1x128xf32> to vector<256x128xf32>
    %8 = arith.addf %5, %7 : vector<256x128xf32>
    %cst_7 = arith.constant 0.000000e+00 : f32
    %9 = vector.broadcast %cst_7 : f32 to vector<256x128xf32>
    %10 = arith.subf %9, %8 : vector<256x128xf32>
    %11 = math.exp %10 : vector<256x128xf32>
    %cst_8 = arith.constant 1.000000e+00 : f32
    %12 = vector.broadcast %cst_8 : f32 to vector<256x128xf32>
    %13 = arith.addf %12, %11 : vector<256x128xf32>
    %14 = tpu.reciprocal %13 {approx = true} : vector<256x128xf32> -> vector<256x128xf32>
    %15 = arith.mulf %8, %14 : vector<256x128xf32>
    %c0_9 = arith.constant 0 : index
    %c0_10 = arith.constant 0 : index
    %16 = vector.load %arg5[%c0_9, %c0_10] : memref<256x128xf32, #tpu.memory_space<vmem>>, vector<256x128xf32>
    tpu.vector_store %arg5[%c0_9, %c0_10], %15 {strides = array<i32>} : memref<256x128xf32, #tpu.memory_space<vmem>>, vector<256x128xf32>,
    return
  }
  func.func @transform_0(%arg0: i32) -> (i32, i32) {
    %c0_i32 = arith.constant 0 : i32
    %c0_i32_0 = arith.constant 0 : i32
    return %arg0, %c0_i32 : i32, i32
  }
  func.func @transform_1(%arg0: i32) -> (i32, i32) {
    %c0_i32 = arith.constant 0 : i32
    %c0_i32_0 = arith.constant 0 : i32
    %c0_i32_1 = arith.constant 0 : i32
    return %c0_i32, %c0_i32_0 : i32, i32
  }
  func.func @transform_2(%arg0: i32) -> (i32, i32) {
    %c0_i32 = arith.constant 0 : i32
    %c0_i32_0 = arith.constant 0 : i32
    %c0_i32_1 = arith.constant 0 : i32
    return %c0_i32, %c0_i32_0 : i32, i32
  }
  func.func @transform_3(%arg0: i32) -> (i32, i32) {
    %c0_i32 = arith.constant 0 : i32
    %c0_i32_0 = arith.constant 0 : i32
    %c0_i32_1 = arith.constant 0 : i32
    return %c0_i32, %c0_i32_0 : i32, i32
  }
  func.func @transform_4(%arg0: i32) -> (i32, i32) {
    %c0_i32 = arith.constant 0 : i32
    %c0_i32_0 = arith.constant 0 : i32
    return %arg0, %c0_i32 : i32, i32
  }
}

</mosaic_0001>

<bundles_post_ra>
// kernel: tpu_custom_call.1
= control target key start
LH: loop header
LB: loop body
LE: loop exit
PB: predicated region body
PF: predicated region fallthrough
CT: control target
= control target key end

     0   :  { %9 = vsyncpa [#allocation3], 0  ;;  %s1801_s0 = inlined_call_operand.vmem [shape: f32[512,32], index: 0, kind: input, shape index: {}]   ;;  %s1802_s1 = inlined_call_operand.vmem [shape: f32[32,128], index: 1, kind: input, shape index: {}]   ;;  %s1803_s2 = inlined_call_operand.vmem [shape: f32[1,128], index: 2, kind: input, shape index: {}]   ;;  %s1804_s3 = inlined_call_operand.vmem [shape: f32[1,128], index: 3, kind: input, shape index: {}]   ;;  %s1805_s4 = inlined_call_operand.hbm [shape: f32[512,128], index: 4, kind: output, shape index: {}]  }
   0x1   :  { %11 = vsyncpa [#allocation3 + $0x1], 0  ;;  %s1347_s15 = smov 0   ;;  %s1349_s16 = smov 0  }
   0x2   :  { %s1351_s17 = smov 0   ;;  %s1353_s18 = smov 0  }
   0x3 LB: > { %s1368_s19 = sadd.s32 4294967295, %s1317_s18   ;;  %s935_s20 = sadd.s32 4294967294, %s1317_s18   ;;  %s1317_s18 = sphi %s1353_s18, %s1811_s18   ;;  %s1313_s17 = sphi %s1351_s17, %s1810_s17   ;;  %s1309_s16 = sphi %s1349_s16, %s1809_s16   ;;  %s1305_s15 = sphi %s1347_s15, %s1808_s15  }
   0x4   : > { %s1372_s21 = sadd.s32 1, %s1317_s18   ;;  %s113_s22 = sadd.s32 1, %s1313_s17 }
   0x5   : > { %s110_s23 = ssub.s32 %s1317_s18, %s1372_s21  ;;  %p123_p0 = scmp.ne.s32.totalorder %s1313_s17, %s1309_s16 }
   0x6   : > { %p111_p1 = scmp.eq.s32.totalorder %s110_s23, 0  ;;  %p124_p2 = scmp.eq.s32.totalorder %s1368_s19, 1 }
   0x7   : > { %p129_p3 = scmp.ne.s32.totalorder %s1309_s16, %s1305_s15  ;;  %p130_p4 = scmp.eq.s32.totalorder %s935_s20, 1 }
   0x8   : > { %s1383_s24 = scalar_select %p111_p1, %s1313_s17, %s113_s22  }
   0x9   : > { %p1385_p5 = por %p124_p2, %p123_p0  ;;  %p1389_p6 = por %p130_p4, %p129_p3 }
   0xa   : > { %p938_p7 = scmp.ge.s32.totalorder %s1317_s18, 1  ;;  %p166_p8 = scmp.lt.s32.totalorder %s1317_s18, 3 }
   0xc   : > { %p167_p9 = pnand %p938_p7, %p166_p8 }
   0xd   : > { %v231_v0 = vld [vmem:[%s1802_s1] sm:$0xff] (!%p167_p9)  ;;  %v232_v1 = vld [vmem:[%s1802_s1 + $0x8] sm:$0xff] (!%p167_p9)  ;;  %v233_v2 = vld [vmem:[%s1802_s1 + $0x10] sm:$0xff] (!%p167_p9)  ;;  %s940_s7 = sshll.u32 (!%p167_p9), %s1368_s19, 5  ;;  %vm235_vm0 = vcmask (!%p167_p9), 261120   ;;  %s189_s27 = sand.u32 (!%p167_p9), 1, %s1309_s16  }
   0xe   : > { %170 = sbr.rel (%p167_p9) target bundleno = 345 (0x159), region = 36  ;;  %v1074_v3 = vpack.c.bf16 (!%p167_p9), %v232_v1, %v231_v0  ;;  %v234_v4 = vld [vmem:[%s1802_s1 + $0x18] sm:$0xff] (!%p167_p9)  ;;  %p193_p10 = scmp.lt.s32.totalorder (!%p167_p9), %s940_s7, 63  ;;  %v1480_v38 = vld [vmem:[%s1803_s2] ss:$0 sm:$0xff] (!%p167_p9) }
   0xf   : > { %v1078_v5 = vpack.c.bf16 (!%p167_p9), %v234_v4, %v233_v2  ;;  %v1485_v40 = vld [vmem:[%s1804_s3] ss:$0 sm:$0xff] (!%p167_p9)  ;;  %s1601_s28 = sshll.u32 (!%p167_p9), %s189_s27, 8  ;;  %s981_s30 = sshll.u32 (!%p167_p9), %s1368_s19, 12 }
  0x10   : > { %1075 = vmatprep.subr.bf16.mxu0 (!%p167_p9), %v1074_v3  ;;  %1082 = vmatprep.subr.bf16.mxu1 (!%p167_p9), %v1074_v3  ;;  %s1630_s29 = scalar_lea.vmem (!%p167_p9), [#allocation2], %s1601_s28  ;;  %s1750_s19 = scalar_lea.hbm (!%p167_p9), %s1805_s4, %s981_s30 }
  0x11   : > { %1077 = vmatpush3.bf16.msra.mxu0 (!%p167_p9), %v1074_v3  ;;  %1084 = vmatpush3.bf16.msra.mxu1 (!%p167_p9), %v1074_v3  ;;  %s873_s5 = sshll.u32 (!%p167_p9), %s1630_s29, 4  ;;  %s1760_s8 = scalar_lea.sflag (!%p167_p9), [#allocation3], %s189_s27  ;;  %s1752_s5 = int_to_ptr.vmem [resolvable:$true] %s873_s5 }
  0x12   : > { %1079 = vmatprep.subr.bf16.mxu0 (!%p167_p9), %v1078_v5  ;;  %1083 = vmatprep.subr.bf16.mxu1 (!%p167_p9), %v1078_v5  ;;  %s1255_s9 = scalar_lea.vmem (!%p167_p9), %s1752_s5, 4096 }
  0x13   : > { %p1256_p11 = scmp.ne.s32.totalorder (!%p167_p9), %s1752_s5, %s1255_s9 }
  0x15   : > { %s1813_s7 = smov (!%p193_p10, %s940_s7), 63  ;;  %1081 = vmatpush3.bf16.msra.mxu0 %v1078_v5  ;;  %1085 = vmatpush3.bf16.msra.mxu1 %v1078_v5  ;;  %p1257_p12 = pnand %p1256_p11, %p1385_p5 }
  0x16   : > { %s941_s10 = sshll.u32 %s1813_s7, 3 }
  0x17   : > { %s1411_s13 = scalar_lea.vmem %s1801_s0, %s941_s10  ;;  %p1258_p13 = pneg %p1257_p12 }
  0x18   : > { %v199_v6 = vld [vmem:[%s1411_s13] sm:$0xff]  ;;  %v200_v8 = vld [vmem:[%s1411_s13 + $0x8] sm:$0xff]  ;;  %v201_v10 = vld [vmem:[%s1411_s13 + $0x10] sm:$0xff]  ;;  %s1319_s10 = smov [#allocation2]  }
  0x19   : > { %v215_v7 = vld [vmem:[%s1411_s13 + $0x80] sm:$0xff]  ;;  %v216_v9 = vld [vmem:[%s1411_s13 + $0x88] sm:$0xff]  ;;  %1026 = vmatprep.mubr.msk.f32.mxu0 %vm235_vm0, %v199_v6  ;;  %v217_v11 = vld [vmem:[%s1411_s13 + $0x90] sm:$0xff]  ;;  %s1259_s11 = sshll.u32 %s1319_s10, 4  ;;  %s1260_s11 = int_to_ptr.vmem [resolvable:$false] %s1259_s11 }
  0x1a   : > { %1050 = vmatprep.mubr.msk.f32.mxu1 %vm235_vm0, %v215_v7  ;;  %1027 = vmatmul.mubr.msk.f32.vlgmr.msra.gmra.mrb[0].mxu0 %vm235_vm0, %v200_v8  ;;  %v202_v12 = vld [vmem:[%s1411_s13 + $0x18] sm:$0xff]  ;;  %v203_v14 = vld [vmem:[%s1411_s13 + $0x20] sm:$0xff]  ;;  %v204_v16 = vld [vmem:[%s1411_s13 + $0x28] sm:$0xff]  ;;  %s1261_s12 = scalar_lea.vmem %s1260_s11, 8192  ;;  %p1262_p0 = scmp.lt.s32.totalorder %s1752_s5, %s1260_s11 }
  0x1b   : > { %1051 = vmatmul.mubr.msk.f32.vlgmr.msra.gmra.mrb[0].mxu1 %vm235_vm0, %v216_v9  ;;  %1029 = vmatprep.mubr.msk.f32.mxu0 %vm235_vm0, %v201_v10  ;;  %v218_v13 = vld [vmem:[%s1411_s13 + $0x98] sm:$0xff]  ;;  %v219_v15 = vld [vmem:[%s1411_s13 + $0xa0] sm:$0xff]  ;;  %v220_v17 = vld [vmem:[%s1411_s13 + $0xa8] sm:$0xff]  ;;  %p1263_p1 = scmp.lt.s32.totalorder %s1261_s12, %s1255_s9 }
  0x1c   : > { %1053 = vmatprep.mubr.msk.f32.mxu1 %vm235_vm0, %v217_v11  ;;  %v205_v18 = vld [vmem:[%s1411_s13 + $0x30] sm:$0xff]  ;;  %v206_v20 = vld [vmem:[%s1411_s13 + $0x38] sm:$0xff]  ;;  %v207_v22 = vld [vmem:[%s1411_s13 + $0x40] sm:$0xff] }
  0x1d   : > { %v221_v19 = vld [vmem:[%s1411_s13 + $0xb0] sm:$0xff]  ;;  %v222_v21 = vld [vmem:[%s1411_s13 + $0xb8] sm:$0xff]  ;;  %v223_v23 = vld [vmem:[%s1411_s13 + $0xc0] sm:$0xff]  ;;  %p1264_p2 = por %p1263_p1, %p1262_p0 }
  0x1e   : > { %1030 = vmatmul.mubr.msk.f32.gmra.mrb[2].mxu0 %vm235_vm0, %v202_v12  ;;  %v208_v24 = vld [vmem:[%s1411_s13 + $0x48] sm:$0xff]  ;;  %v209_v26 = vld [vmem:[%s1411_s13 + $0x50] sm:$0xff]  ;;  %v210_v28 = vld [vmem:[%s1411_s13 + $0x58] sm:$0xff] }
  0x1f   : > { %1054 = vmatmul.mubr.msk.f32.gmra.mrb[2].mxu1 %vm235_vm0, %v218_v13  ;;  %1032 = vmatprep.mubr.msk.f32.mxu0 %vm235_vm0, %v203_v14  ;;  %v224_v25 = vld [vmem:[%s1411_s13 + $0xc8] sm:$0xff]  ;;  %v225_v27 = vld [vmem:[%s1411_s13 + $0xd0] sm:$0xff]  ;;  %v226_v29 = vld [vmem:[%s1411_s13 + $0xd8] sm:$0xff]  ;;  %p1265_p3 = pnand %p1264_p2, %p1258_p13 }
  0x20   : > { %1056 = vmatprep.mubr.msk.f32.mxu1 %vm235_vm0, %v219_v15  ;;  %v211_v30 = vld [vmem:[%s1411_s13 + $0x60] sm:$0xff]  ;;  %v212_v32 = vld [vmem:[%s1411_s13 + $0x68] sm:$0xff]  ;;  %v213_v34 = vld [vmem:[%s1411_s13 + $0x70] sm:$0xff] }
  0x21   : > { %v227_v31 = vld [vmem:[%s1411_s13 + $0xe0] sm:$0xff]  ;;  %v228_v33 = vld [vmem:[%s1411_s13 + $0xe8] sm:$0xff]  ;;  %v229_v35 = vld [vmem:[%s1411_s13 + $0xf0] sm:$0xff] }
  0x22   : > { %1033 = vmatmul.mubr.msk.f32.gmra.mrb[4].mxu0 %vm235_vm0, %v204_v16  ;;  %v214_v36 = vld [vmem:[%s1411_s13 + $0x78] sm:$0xff] }
  0x23   : > { %1057 = vmatmul.mubr.msk.f32.gmra.mrb[4].mxu1 %vm235_vm0, %v220_v17  ;;  %1035 = vmatprep.mubr.msk.f32.mxu0 %vm235_vm0, %v205_v18  ;;  %v230_v37 = vld [vmem:[%s1411_s13 + $0xf8] sm:$0xff] }
  0x24   : > { %1059 = vmatprep.mubr.msk.f32.mxu1 %vm235_vm0, %v221_v19 }
  0x26   : > { %1036 = vmatmul.mubr.msk.f32.gmra.mrb[6].mxu0 %vm235_vm0, %v206_v20 }
  0x27   : > { %1060 = vmatmul.mubr.msk.f32.gmra.mrb[6].mxu1 %vm235_vm0, %v222_v21  ;;  %1038 = vmatprep.mubr.msk.f32.mxu0 %vm235_vm0, %v207_v22 }
  0x28   : > { %1062 = vmatprep.mubr.msk.f32.mxu1 %vm235_vm0, %v223_v23 }
  0x2a   : > { %1039 = vmatmul.mubr.msk.f32.gmra.mrb[8].mxu0 %vm235_vm0, %v208_v24 }
  0x2b   : > { %1063 = vmatmul.mubr.msk.f32.gmra.mrb[8].mxu1 %vm235_vm0, %v224_v25  ;;  %1041 = vmatprep.mubr.msk.f32.mxu0 %vm235_vm0, %v209_v26 }
  0x2c   : > { %1065 = vmatprep.mubr.msk.f32.mxu1 %vm235_vm0, %v225_v27 }
  0x2e   : > { %1042 = vmatmul.mubr.msk.f32.gmra.mrb[10].mxu0 %vm235_vm0, %v210_v28 }
  0x2f   : > { %1066 = vmatmul.mubr.msk.f32.gmra.mrb[10].mxu1 %vm235_vm0, %v226_v29  ;;  %1044 = vmatprep.mubr.msk.f32.mxu0 %vm235_vm0, %v211_v30 }
  0x30   : > { %1068 = vmatprep.mubr.msk.f32.mxu1 %vm235_vm0, %v227_v31 }
  0x32   : > { %1045 = vmatmul.mubr.msk.f32.gmra.mrb[12].mxu0 %vm235_vm0, %v212_v32 }
  0x33   : > { %1069 = vmatmul.mubr.msk.f32.gmra.mrb[12].mxu1 %vm235_vm0, %v228_v33  ;;  %1047 = vmatprep.mubr.msk.f32.mxu0 %vm235_vm0, %v213_v34 }
  0x34   : > { %1071 = vmatprep.mubr.msk.f32.mxu1 %vm235_vm0, %v229_v35 }
  0x36   : > { %1048 = vmatmul.mubr.msk.f32.gmra.mrb[14].mxu0 %vm235_vm0, %v214_v36 }
  0x37   : > { %1072 = vmatmul.mubr.msk.f32.gmra.mrb[14].mxu1 %vm235_vm0, %v230_v37 }
  0xed   : > { %v1028_v39 = vpop.f32.mrb[0].mxu0 }
  0xee   : > { %v1052_v41 = vpop.f32.mrb[0].mxu1  ;;  %v565_v42 = vmul.f32 %v1028_v39, %v1480_v38  ;;  %v398_v44 = vpop.f32.mrb[1].mxu0 }
  0xef   : > { %v581_v43 = vmul.f32 %v1052_v41, %v1480_v38  ;;  %v478_v45 = vpop.f32.mrb[1].mxu1  ;;  %v564_v46 = vmul.f32 %v1480_v38, %v398_v44 }
  0xf0   : > { %v580_v47 = vmul.f32 %v1480_v38, %v478_v45  ;;  %v1492_v48 = vadd.f32 %v1485_v40, %v565_v42 }
  0xf1   : > { %v1495_v49 = vadd.f32 %v1485_v40, %v581_v43  ;;  %v1498_v50 = vadd.f32 %v1485_v40, %v564_v46  ;;  %v1031_v52 = vpop.f32.mrb[2].mxu0 }
  0xf2   : > { %v1501_v51 = vadd.f32 %v1485_v40, %v580_v47  ;;  %v1055_v53 = vpop.f32.mrb[2].mxu1  ;;  %v636_v54 = vsub.f32 0.0, %v1492_v48  ;;  %v567_v56 = vmul.f32 %v1031_v52, %v1480_v38  ;;  %v408_v58 = vpop.f32.mrb[3].mxu0 }
  0xf3   : > { %v652_v55 = vsub.f32 0.0, %v1495_v49  ;;  %v583_v57 = vmul.f32 %v1055_v53, %v1480_v38  ;;  %v488_v59 = vpop.f32.mrb[3].mxu1  ;;  %v635_v60 = vsub.f32 0.0, %v1498_v50  ;;  %v566_v62 = vmul.f32 %v1480_v38, %v408_v58 }
  0xf4   : > { %v651_v61 = vsub.f32 0.0, %v1501_v51  ;;  %v582_v63 = vmul.f32 %v1480_v38, %v488_v59  ;;  %v669_v0 = vmul.f32 1.442695, %v636_v54  ;;  %v1512_v2 = vadd.f32 %v1485_v40, %v567_v56 }
  0xf5   : > { %v701_v1 = vmul.f32 1.442695, %v652_v55  ;;  %v1515_v3 = vadd.f32 %v1485_v40, %v583_v57  ;;  %v667_v4 = vmul.f32 1.442695, %v635_v60  ;;  %v1518_v6 = vadd.f32 %v1485_v40, %v566_v62  ;;  %v1034_v8 = vpop.f32.mrb[4].mxu0 }
  0xf6   : > { %v699_v5 = vmul.f32 1.442695, %v651_v61  ;;  %v1521_v7 = vadd.f32 %v1485_v40, %v582_v63  ;;  %v1058_v9 = vpop.f32.mrb[4].mxu1  ;;  %1127 = vpow2.f32 %v669_v0  ;;  %v638_v10 = vsub.f32 0.0, %v1512_v2  ;;  %v418_v13 = vpop.f32.mrb[5].mxu0 }
  0xf7   : > { %v654_v11 = vsub.f32 0.0, %v1515_v3  ;;  %v569_v12 = vmul.f32 %v1034_v8, %v1480_v38  ;;  %v498_v14 = vpop.f32.mrb[5].mxu1  ;;  %1129 = vpow2.f32 %v701_v1  ;;  %v637_v15 = vsub.f32 0.0, %v1518_v6 }
  0xf8   : > { %v653_v16 = vsub.f32 0.0, %v1521_v7  ;;  %v585_v17 = vmul.f32 %v1058_v9, %v1480_v38  ;;  %1131 = vpow2.f32 %v667_v4  ;;  %v673_v18 = vmul.f32 1.442695, %v638_v10 }
  0xf9   : > { %v705_v19 = vmul.f32 1.442695, %v654_v11  ;;  %v1530_v20 = vadd.f32 %v1485_v40, %v569_v12  ;;  %1133 = vpow2.f32 %v699_v5  ;;  %v671_v21 = vmul.f32 1.442695, %v637_v15  ;;  %v1037_v24 = vpop.f32.mrb[6].mxu0 }
  0xfa   : > { %v703_v22 = vmul.f32 1.442695, %v653_v16  ;;  %v1533_v23 = vadd.f32 %v1485_v40, %v585_v17  ;;  %v1061_v25 = vpop.f32.mrb[6].mxu1  ;;  %1135 = vpow2.f32 %v673_v18  ;;  %v568_v27 = vmul.f32 %v1480_v38, %v418_v13  ;;  %v428_v29 = vpop.f32.mrb[7].mxu0 }
  0xfb   : > { %v640_v26 = vsub.f32 0.0, %v1530_v20  ;;  %v584_v28 = vmul.f32 %v1480_v38, %v498_v14  ;;  %v508_v30 = vpop.f32.mrb[7].mxu1  ;;  %1137 = vpow2.f32 %v705_v19  ;;  %v571_v32 = vmul.f32 %v1037_v24, %v1480_v38 }
  0xfc   : > { %v656_v31 = vsub.f32 0.0, %v1533_v23  ;;  %v587_v33 = vmul.f32 %v1061_v25, %v1480_v38  ;;  %1139 = vpow2.f32 %v671_v21  ;;  %v1542_v35 = vadd.f32 %v1485_v40, %v568_v27 }
  0xfd   : > { %v677_v34 = vmul.f32 1.442695, %v640_v26  ;;  %v1545_v36 = vadd.f32 %v1485_v40, %v584_v28  ;;  %1141 = vpow2.f32 %v703_v22  ;;  %v1548_v39 = vadd.f32 %v1485_v40, %v571_v32  ;;  %v1040_v42 = vpop.f32.mrb[8].mxu0 }
  0xfe   : > { %v709_v37 = vmul.f32 1.442695, %v656_v31  ;;  %v1551_v41 = vadd.f32 %v1485_v40, %v587_v33  ;;  %v1064_v43 = vpop.f32.mrb[8].mxu1  ;;  %v639_v44 = vsub.f32 0.0, %v1542_v35  ;;  %v570_v46 = vmul.f32 %v1480_v38, %v428_v29  ;;  %v438_v47 = vpop.f32.mrb[9].mxu0 }
  0xff   : > { %1143 = vpow2.f32 %v677_v34  ;;  %v655_v45 = vsub.f32 0.0, %v1545_v36  ;;  %v518_v52 = vpop.f32.mrb[9].mxu1  ;;  %v586_v53 = vmul.f32 %v1480_v38, %v508_v30  ;;  %v642_v56 = vsub.f32 0.0, %v1548_v39 }
 0x100   : > { %1145 = vpow2.f32 %v709_v37  ;;  %v1128_v54 = vpop.eup %1127  ;;  %v675_v55 = vmul.f32 1.442695, %v639_v44  ;;  %v573_v57 = vmul.f32 %v1040_v42, %v1480_v38  ;;  %v658_v60 = vsub.f32 0.0, %v1551_v41 }
 0x101   : > { %v1130_v58 = vpop.eup %1129  ;;  %v732_v59 = vadd.f32 1.0, %v1128_v54  ;;  %v1561_v61 = vadd.f32 %v1485_v40, %v570_v46  ;;  %v1043_v62 = vpop.f32.mrb[10].mxu0  ;;  %v1563_v1 = vmul.f32 1.442695, %v655_v45  ;;  %v1566_v10 = vadd.f32 %v1485_v40, %v586_v53 }
 0x102   : > { %v1132_v63 = vpop.eup %1131  ;;  %v748_v0 = vadd.f32 1.0, %v1130_v58  ;;  %1147 = vpow2.f32 %v675_v55  ;;  %v1067_v4 = vpop.f32.mrb[10].mxu1  ;;  %v589_v11 = vmul.f32 %v1064_v43, %v1480_v38  ;;  %v681_v15 = vmul.f32 1.442695, %v642_v56 }
 0x103   : > { %v448_v5 = vpop.f32.mrb[11].mxu0  ;;  %v1134_v8 = vpop.eup %1133  ;;  %1149 = vrcp.f32 %v732_v59  ;;  %v731_v9 = vadd.f32 1.0, %v1132_v63  ;;  %v1570_v16 = vadd.f32 %v1485_v40, %v573_v57  ;;  %v1572_v19 = vmul.f32 1.442695, %v658_v60 }
 0x104   : > { %v528_v12 = vpop.f32.mrb[11].mxu1  ;;  %v1136_v13 = vpop.eup %1135  ;;  %1151 = vrcp.f32 %v748_v0  ;;  %v747_v14 = vadd.f32 1.0, %v1134_v8  ;;  %v641_v21 = vsub.f32 0.0, %v1561_v61  ;;  %v1580_v27 = vadd.f32 %v1485_v40, %v589_v11 }
 0x105   : > { %v1138_v17 = vpop.eup %1137  ;;  %1153 = vrcp.f32 %v731_v9  ;;  %v734_v18 = vadd.f32 1.0, %v1136_v13  ;;  %v1575_v22 = vpop.f32.mrb[12].mxu0  ;;  %v572_v28 = vmul.f32 %v1480_v38, %v438_v47  ;;  %v657_v33 = vsub.f32 0.0, %v1566_v10 }
 0x106   : > { %v1577_v24 = vpop.f32.mrb[12].mxu1  ;;  %v1140_v25 = vpop.eup %1139  ;;  %1155 = vrcp.f32 %v747_v14  ;;  %v750_v26 = vadd.f32 1.0, %v1138_v17  ;;  %v588_v34 = vmul.f32 %v1480_v38, %v518_v52  ;;  %v644_v43 = vsub.f32 0.0, %v1570_v16 }
 0x107   : > { %v1583_v29 = vpop.f32.mrb[13].mxu0  ;;  %v1585_v30 = vpop.f32.mrb[13].mxu1  ;;  %1157 = vrcp.f32 %v734_v18  ;;  %v733_v32 = vadd.f32 1.0, %v1140_v25  ;;  %v575_v44 = vmul.f32 %v1043_v62, %v1480_v38  ;;  %v679_v47 = vmul.f32 1.442695, %v641_v21 }
 0x108   : > { %v1142_v31 = vpop.eup %1141  ;;  %1159 = vrcp.f32 %v750_v26  ;;  %v1593_v53 = vadd.f32 %v1485_v40, %v572_v28  ;;  %v660_v56 = vsub.f32 0.0, %v1580_v27  ;;  %v1605_v57 = vadd.f32 %v1485_v40, %v588_v34 }
 0x109   : > { %v1144_v37 = vpop.eup %1143  ;;  %v749_v42 = vadd.f32 1.0, %v1142_v31  ;;  %1161 = vrcp.f32 %v733_v32  ;;  %v1595_v54 = vpop.f32.mrb[14].mxu0  ;;  %v1612_v60 = vadd.f32 %v1485_v40, %v575_v44  ;;  %v591_v62 = vmul.f32 %v1067_v4, %v1480_v38 }
 0x10a   : > { %v1146_v45 = vpop.eup %1145  ;;  %v736_v46 = vadd.f32 1.0, %v1144_v37  ;;  %v1597_v55 = vpop.f32.mrb[14].mxu1  ;;  %v574_v63 = vmul.f32 %v1480_v38, %v448_v5  ;;  %v711_v8 = vmul.f32 1.442695, %v657_v33  ;;  %v685_v9 = vmul.f32 1.442695, %v644_v43 }
 0x10b   : > { %1163 = vrcp.f32 %v749_v42  ;;  %v752_v52 = vadd.f32 1.0, %v1146_v45  ;;  %v1607_v58 = vpop.f32.mrb[15].mxu0  ;;  %v1609_v59 = vpop.f32.mrb[15].mxu1  ;;  %v590_v11 = vmul.f32 %v1480_v38, %v528_v12  ;;  %v643_v17 = vsub.f32 0.0, %v1593_v53 }
 0x10c   : > { %1165 = vrcp.f32 %v736_v46  ;;  %v1148_v0 = vpop.eup %1147  ;;  %v1620_v18 = vadd.f32 %v1485_v40, %v591_v62  ;;  %v659_v5 = vsub.f32 0.0, %v1605_v57  ;;  %v1625_v25 = vadd.f32 %v1485_v40, %v574_v63 }
 0x10d   : > { %1167 = vrcp.f32 %v752_v52  ;;  %v1150_v13 = vpop.eup %1149  ;;  %v735_v14 = vadd.f32 1.0, %v1148_v0  ;;  %v717_v28 = vmul.f32 1.442695, %v660_v56  ;;  %v683_v34 = vmul.f32 1.442695, %v643_v17 }
 0x10e   : > { %1169 = vpow2.f32 %v1563_v1  ;;  %v1152_v21 = vpop.eup %1151  ;;  %v796_v4 = vmul.f32 %v1150_v13, %v1492_v48  ;;  %v646_v1 = vsub.f32 0.0, %v1612_v60  ;;  %v645_v37 = vsub.f32 0.0, %v1625_v25 }
 0x10f   : > { %1171 = vpow2.f32 %v681_v15  ;;  %v1154_v12 = vpop.eup %1153  ;;  %v812_v26 = vmul.f32 %v1152_v21, %v1495_v49  ;;  %v662_v15 = vsub.f32 0.0, %v1620_v18  ;;  %v1637_v49 = vadd.f32 %v1485_v40, %v590_v11 }
 0x110   : > { %1173 = vrcp.f32 %v735_v14  ;;  %v1156_v31 = vpop.eup %1155  ;;  %828 = vst [vmem:[%s1630_s29 + $0x8] sm:$0xff] %v796_v4  ;;  %v795_v48 = vmul.f32 %v1154_v12, %v1498_v50  ;;  %v689_v45 = vmul.f32 1.442695, %v646_v1  ;;  %v687_v62 = vmul.f32 1.442695, %v645_v37 }
 0x111   : > { %1175 = vpow2.f32 %v1572_v19  ;;  %v1158_v32 = vpop.eup %1157  ;;  %844 = vst [vmem:[%s1630_s29 + $0x88] sm:$0xff] %v812_v26  ;;  %v811_v33 = vmul.f32 %v1156_v31, %v1501_v51  ;;  %v715_v19 = vmul.f32 1.442695, %v659_v5  ;;  %v661_v52 = vsub.f32 0.0, %v1637_v49 }
 0x112   : > { %1177 = vpow2.f32 %v679_v47  ;;  %v1160_v42 = vpop.eup %1159  ;;  %827 = vst [vmem:[%s1630_s29] sm:$0xff] %v795_v48  ;;  %v798_v50 = vmul.f32 %v1158_v32, %v1512_v2  ;;  %v721_v47 = vmul.f32 1.442695, %v662_v15  ;;  %v576_v21 = vmul.f32 %v1480_v38, %v1583_v29 }
 0x113   : > { %1179 = vpow2.f32 %v711_v8  ;;  %v1162_v43 = vpop.eup %1161  ;;  %843 = vst [vmem:[%s1630_s29 + $0x80] sm:$0xff] %v811_v33  ;;  %v814_v44 = vmul.f32 %v1160_v42, %v1515_v3  ;;  %v577_v3 = vmul.f32 %v1575_v22, %v1480_v38  ;;  %v593_v22 = vmul.f32 %v1577_v24, %v1480_v38 }
 0x114   : > { %1181 = vpow2.f32 %v685_v9  ;;  %830 = vst [vmem:[%s1630_s29 + $0x18] sm:$0xff] %v798_v50  ;;  %v797_v51 = vmul.f32 %v1162_v43, %v1518_v6  ;;  %v592_v24 = vmul.f32 %v1480_v38, %v1585_v30  ;;  %v595_v48 = vmul.f32 %v1597_v55, %v1480_v38 }
 0x115   : > { %v1164_v46 = vpop.eup %1163  ;;  %1183 = vpow2.f32 %v717_v28  ;;  %846 = vst [vmem:[%s1630_s29 + $0x98] sm:$0xff] %v814_v44  ;;  %v1671_v28 = vadd.f32 %v1485_v40, %v593_v22  ;;  %v1679_v32 = vadd.f32 %v1485_v40, %v576_v21  ;;  %v578_v33 = vmul.f32 %v1480_v38, %v1607_v58 }
 0x116   : > { %v1166_v2 = vpop.eup %1165  ;;  %v813_v56 = vmul.f32 %v1164_v46, %v1521_v7  ;;  %1185 = vpow2.f32 %v683_v34  ;;  %829 = vst [vmem:[%s1630_s29 + $0x10] sm:$0xff] %v797_v51  ;;  %v719_v7 = vmul.f32 1.442695, %v661_v52  ;;  %v1684_v37 = vadd.f32 %v1485_v40, %v592_v24 }
 0x117   : > { %v1168_v63 = vpop.eup %1167  ;;  %v800_v0 = vmul.f32 %v1166_v2, %v1530_v20  ;;  %1187 = vpow2.f32 %v715_v19  ;;  %v1662_v20 = vadd.f32 %v1485_v40, %v577_v3  ;;  %v594_v42 = vmul.f32 %v1480_v38, %v1609_v59 }
 0x118   : > { %v1170_v6 = vpop.eup %1169  ;;  %845 = vst [vmem:[%s1630_s29 + $0x90] sm:$0xff] %v813_v56  ;;  %v816_v8 = vmul.f32 %v1168_v63, %v1533_v23  ;;  %1189 = vpow2.f32 %v689_v45  ;;  %v664_v19 = vsub.f32 0.0, %v1671_v28  ;;  %v1693_v46 = vadd.f32 %v1485_v40, %v595_v48 }
 0x119   : > { %v1172_v9 = vpop.eup %1171  ;;  %832 = vst [vmem:[%s1630_s29 + $0x28] sm:$0xff] %v800_v0  ;;  %v751_v11 = vadd.f32 1.0, %v1170_v6  ;;  %1191 = vpow2.f32 %v721_v47  ;;  %v648_v29 = vsub.f32 0.0, %v1662_v20  ;;  %v1697_v59 = vadd.f32 %v1485_v40, %v578_v33 }
 0x11a   : > { %v1174_v13 = vpop.eup %1173  ;;  %848 = vst [vmem:[%s1630_s29 + $0xa8] sm:$0xff] %v816_v8  ;;  %v738_v14 = vadd.f32 1.0, %v1172_v9  ;;  %1193 = vpow2.f32 %v687_v62  ;;  %v663_v56 = vsub.f32 0.0, %v1684_v37  ;;  %v1701_v62 = vadd.f32 %v1485_v40, %v594_v42 }
 0x11b   : > { %v1176_v17 = vpop.eup %1175  ;;  %v799_v23 = vmul.f32 %v1174_v13, %v1542_v35  ;;  %1195 = vrcp.f32 %v751_v11  ;;  %v579_v35 = vmul.f32 %v1595_v54, %v1480_v38  ;;  %v693_v45 = vmul.f32 1.442695, %v648_v29 }
 0x11c   : > { %v1178_v4 = vpop.eup %1177  ;;  %1197 = vrcp.f32 %v738_v14  ;;  %v754_v5 = vadd.f32 1.0, %v1176_v17  ;;  %v647_v38 = vsub.f32 0.0, %v1679_v32  ;;  %v725_v0 = vmul.f32 1.442695, %v664_v19 }
 0x11d   : > { %v1180_v12 = vpop.eup %1179  ;;  %831 = vst [vmem:[%s1630_s29 + $0x20] sm:$0xff] %v799_v23  ;;  %v737_v26 = vadd.f32 1.0, %v1178_v4  ;;  %1199 = vpow2.f32 %v719_v7  ;;  %v1690_v43 = vadd.f32 %v1485_v40, %v579_v35  ;;  %v666_v11 = vsub.f32 0.0, %v1693_v46 }
 0x11e   : > { %v1182_v1 = vpop.eup %1181  ;;  %1201 = vrcp.f32 %v754_v5  ;;  %v753_v31 = vadd.f32 1.0, %v1180_v12  ;;  %v691_v40 = vmul.f32 1.442695, %v647_v38  ;;  %v649_v13 = vsub.f32 0.0, %v1697_v59 }
 0x11f   : > { %v1184_v15 = vpop.eup %1183  ;;  %1203 = vrcp.f32 %v737_v26  ;;  %v740_v30 = vadd.f32 1.0, %v1182_v1  ;;  %v650_v6 = vsub.f32 0.0, %v1690_v43  ;;  %v723_v23 = vmul.f32 1.442695, %v663_v56 }
 0x120   : > { %v1186_v34 = vpop.eup %1185  ;;  %1205 = vrcp.f32 %v753_v31  ;;  %v756_v54 = vadd.f32 1.0, %v1184_v15  ;;  %v665_v21 = vsub.f32 0.0, %v1701_v62  ;;  %v729_v12 = vmul.f32 1.442695, %v666_v11 }
 0x121   : > { %v1188_v50 = vpop.eup %1187  ;;  %1207 = vrcp.f32 %v740_v30  ;;  %v739_v55 = vadd.f32 1.0, %v1186_v34  ;;  %v697_v5 = vmul.f32 1.442695, %v650_v6  ;;  %v695_v1 = vmul.f32 1.442695, %v649_v13 }
 0x122   : > { %v1190_v44 = vpop.eup %1189  ;;  %1209 = vrcp.f32 %v756_v54  ;;  %v755_v58 = vadd.f32 1.0, %v1188_v50  ;;  %v727_v29 = vmul.f32 1.442695, %v665_v21 }
 0x123   : > { %v1192_v51 = vpop.eup %1191  ;;  %1211 = vrcp.f32 %v739_v55  ;;  %v742_v47 = vadd.f32 1.0, %v1190_v44 }
 0x124   : > { %v1194_v52 = vpop.eup %1193  ;;  %1213 = vrcp.f32 %v755_v58  ;;  %v758_v2 = vadd.f32 1.0, %v1192_v51 }
 0x125   : > { %v1196_v3 = vpop.eup %1195  ;;  %1215 = vrcp.f32 %v742_v47  ;;  %v741_v63 = vadd.f32 1.0, %v1194_v52 }
 0x126   : > { %v1198_v8 = vpop.eup %1197  ;;  %v815_v9 = vmul.f32 %v1196_v3, %v1545_v36  ;;  %1217 = vrcp.f32 %v758_v2 }
 0x127   : > { %v1200_v7 = vpop.eup %1199  ;;  %v802_v22 = vmul.f32 %v1198_v8, %v1548_v39  ;;  %1219 = vrcp.f32 %v741_v63 }
 0x128   : > { %v1202_v14 = vpop.eup %1201  ;;  %847 = vst [vmem:[%s1630_s29 + $0xa0] sm:$0xff] %v815_v9  ;;  %v757_v17 = vadd.f32 1.0, %v1200_v7  ;;  %1221 = vpow2.f32 %v693_v45 }
 0x129   : > { %v1204_v36 = vpop.eup %1203  ;;  %834 = vst [vmem:[%s1630_s29 + $0x38] sm:$0xff] %v802_v22  ;;  %v818_v4 = vmul.f32 %v1202_v14, %v1551_v41  ;;  %1223 = vpow2.f32 %v725_v0 }
 0x12a   : > { %v1206_v39 = vpop.eup %1205  ;;  %v801_v24 = vmul.f32 %v1204_v36, %v1561_v61  ;;  %1225 = vrcp.f32 %v757_v17 }
 0x12b   : > { %v1208_v26 = vpop.eup %1207  ;;  %850 = vst [vmem:[%s1630_s29 + $0xb8] sm:$0xff] %v818_v4  ;;  %v817_v35 = vmul.f32 %v1206_v39, %v1566_v10  ;;  %1227 = vpow2.f32 %v691_v40 }
 0x12c   : > { %v1210_v31 = vpop.eup %1209  ;;  %833 = vst [vmem:[%s1630_s29 + $0x30] sm:$0xff] %v801_v24  ;;  %v804_v41 = vmul.f32 %v1208_v26, %v1570_v16  ;;  %1229 = vpow2.f32 %v723_v23 }
 0x12d   : > { %v1212_v48 = vpop.eup %1211  ;;  %849 = vst [vmem:[%s1630_s29 + $0xb0] sm:$0xff] %v817_v35  ;;  %v820_v61 = vmul.f32 %v1210_v31, %v1580_v27  ;;  %1231 = vpow2.f32 %v697_v5 }
 0x12e   : > { %v1214_v15 = vpop.eup %1213  ;;  %836 = vst [vmem:[%s1630_s29 + $0x48] sm:$0xff] %v804_v41  ;;  %v803_v10 = vmul.f32 %v1212_v48, %v1593_v53  ;;  %1233 = vpow2.f32 %v729_v12 }
 0x12f   : > { %v1216_v30 = vpop.eup %1215  ;;  %852 = vst [vmem:[%s1630_s29 + $0xc8] sm:$0xff] %v820_v61  ;;  %v819_v16 = vmul.f32 %v1214_v15, %v1605_v57  ;;  %1235 = vpow2.f32 %v695_v1 }
 0x130   : > { %v1218_v33 = vpop.eup %1217  ;;  %835 = vst [vmem:[%s1630_s29 + $0x40] sm:$0xff] %v803_v10  ;;  %v806_v34 = vmul.f32 %v1216_v30, %v1612_v60  ;;  %1237 = vpow2.f32 %v727_v29 }
 0x131   : > { %v1220_v27 = vpop.eup %1219  ;;  %851 = vst [vmem:[%s1630_s29 + $0xc0] sm:$0xff] %v819_v16  ;;  %v822_v54 = vmul.f32 %v1218_v33, %v1620_v18 }
 0x132   : > { %v1222_v42 = vpop.eup %1221  ;;  %838 = vst [vmem:[%s1630_s29 + $0x58] sm:$0xff] %v806_v34  ;;  %v805_v53 = vmul.f32 %v1220_v27, %v1625_v25 }
 0x133   : > { %v1224_v50 = vpop.eup %1223  ;;  %854 = vst [vmem:[%s1630_s29 + $0xd8] sm:$0xff] %v822_v54  ;;  %v744_v55 = vadd.f32 1.0, %v1222_v42 }
 0x134   : > { %v1226_v57 = vpop.eup %1225  ;;  %837 = vst [vmem:[%s1630_s29 + $0x50] sm:$0xff] %v805_v53  ;;  %v760_v19 = vadd.f32 1.0, %v1224_v50 }
 0x135   : > { %v1228_v44 = vpop.eup %1227  ;;  %v821_v58 = vmul.f32 %v1226_v57, %v1637_v49  ;;  %1239 = vrcp.f32 %v744_v55 }
 0x136   : > { %v1230_v60 = vpop.eup %1229  ;;  %1241 = vrcp.f32 %v760_v19  ;;  %v743_v45 = vadd.f32 1.0, %v1228_v44 }
 0x137   : > { %v1232_v51 = vpop.eup %1231  ;;  %853 = vst [vmem:[%s1630_s29 + $0xd0] sm:$0xff] %v821_v58  ;;  %v759_v18 = vadd.f32 1.0, %v1230_v60 }
 0x138   : > { %v1234_v47 = vpop.eup %1233  ;;  %1243 = vrcp.f32 %v743_v45  ;;  %v746_v38 = vadd.f32 1.0, %v1232_v51 }
 0x139   : > { %v1236_v25 = vpop.eup %1235  ;;  %1245 = vrcp.f32 %v759_v18  ;;  %v762_v52 = vadd.f32 1.0, %v1234_v47 }
 0x13a   : > { %v1238_v2 = vpop.eup %1237  ;;  %1247 = vrcp.f32 %v746_v38  ;;  %v745_v56 = vadd.f32 1.0, %v1236_v25 }
 0x13b   : > { %1249 = vrcp.f32 %v762_v52  ;;  %v761_v49 = vadd.f32 1.0, %v1238_v2 }
 0x13c   : > { %1251 = vrcp.f32 %v745_v56 }
 0x13d   : > { %1253 = vrcp.f32 %v761_v49 }
 0x13f   : > { %v1240_v3 = vpop.eup %1239 }
 0x140   : > { %v1242_v63 = vpop.eup %1241  ;;  %v808_v0 = vmul.f32 %v1240_v3, %v1662_v20 }
 0x141   : > { %v824_v6 = vmul.f32 %v1242_v63, %v1671_v28 }
 0x142   : > { %v1244_v8 = vpop.eup %1243  ;;  %840 = vst [vmem:[%s1630_s29 + $0x68] sm:$0xff] %v808_v0 }
 0x143   : > { %v1246_v9 = vpop.eup %1245  ;;  %856 = vst [vmem:[%s1630_s29 + $0xe8] sm:$0xff] %v824_v6  ;;  %v807_v11 = vmul.f32 %v1244_v8, %v1679_v32 }
 0x144   : > { %v1248_v7 = vpop.eup %1247  ;;  %v823_v22 = vmul.f32 %v1246_v9, %v1684_v37 }
 0x145   : > { %v1250_v40 = vpop.eup %1249  ;;  %839 = vst [vmem:[%s1630_s29 + $0x60] sm:$0xff] %v807_v11  ;;  %v810_v20 = vmul.f32 %v1248_v7, %v1690_v43 }
 0x146   : > { %v1252_v28 = vpop.eup %1251  ;;  %855 = vst [vmem:[%s1630_s29 + $0xe0] sm:$0xff] %v823_v22  ;;  %v826_v13 = vmul.f32 %v1250_v40, %v1693_v46 }
 0x147   : > { %v1254_v14 = vpop.eup %1253  ;;  %842 = vst [vmem:[%s1630_s29 + $0x78] sm:$0xff] %v810_v20  ;;  %v809_v32 = vmul.f32 %v1252_v28, %v1697_v59 }
 0x148   : > { %858 = vst [vmem:[%s1630_s29 + $0xf8] sm:$0xff] %v826_v13  ;;  %v825_v37 = vmul.f32 %v1254_v14, %v1701_v62 }
 0x149   : > { %841 = vst [vmem:[%s1630_s29 + $0x70] sm:$0xff] %v809_v32 }
 0x14a   : > { %857 = vst [vmem:[%s1630_s29 + $0xf0] sm:$0xff] %v825_v37 }
 0x14b   : > { %1268 = shalt.err (!%p1265_p3)
}
 0x14c   : > { %s1269_s13 = scalar_lea.hbm %s1750_s19, 4096  ;;  %s1273_s22 = scalar_lea.hbm %s1805_s4, 8192 }
 0x14d   : > { %p1270_p4 = scmp.ne.s32.totalorder %s1750_s19, %s1269_s13  ;;  %p1274_p9 = scmp.lt.u32.totalorder %s1750_s19, %s1805_s4 }
 0x14e   : > { %p1275_p10 = scmp.lt.u32.totalorder %s1273_s22, %s1269_s13  ;;  %p1277_p12 = scmp.lt.u32.totalorder %s1269_s13, %s1750_s19 }
 0x14f   : > { %p1271_p7 = pnand %p1270_p4, %p1385_p5 }
 0x150   : > { %p1276_p11 = por %p1275_p10, %p1274_p9 }
 0x151   : > { %p1272_p8 = pneg %p1271_p7 }
 0x152   : > { %p1278_p13 = por %p1277_p12, %p1276_p11 }
 0x154   : > { %p1279_p0 = pnand %p1278_p13, %p1272_p8 }
 0x156   : > { %1282 = shalt.err (!%p1279_p0)
}
 0x157   : > { %s1320_s28 = smov 128   ;;  %s1321_s29 = smov 8  }
 0x158   : > { %1086 = dma.vmem_to_hbm [thread:$0]  (%p1385_p5), %s1752_s5, 4096, %s1750_s19, %s1760_s8, %s1320_s28, %s1320_s28, %s1321_s29  }
 0x159 PF: > { %p1092_p1 = scmp.ge.s32.totalorder %s1317_s18, 2  ;;  %s888_s30 = sand.u32 1, %s1305_s15  }
 0x15a   : > { %s889_s6 = scalar_lea.sflag [#allocation3], %s888_s30 }
 0x15b   : > { %p1089_p2 = pnand %p1092_p1, %p1389_p6 }
 0x15d   : > { %1300 = dma.done.wait (!%p1089_p2), %s889_s6, 4096  }
 0x15e   : > { %1302 = vsyncadd (!%p1089_p2), %s889_s6, 4294963200  ;;  %p14_p3 = scmp.ge.s32.totalorder %s1372_s21, 4   ;;  %s1808_s15 = smov %s1309_s16 }
 0x15f   : > { %s1809_s16 = smov %s1313_s17  ;;  %s1810_s17 = smov %s1383_s24 }
 0x160   : > { %s1811_s18 = smov %s1372_s21  ;;  %16 = sbr.rel (!%p14_p3) target bundleno = 3 (0x3), region = 71 }
 0x167   :  { %894 = vsyncpa [#allocation3], 1 }
 0x168   :  { %896 = vsyncpa [#allocation3 + $0x1], 1 }

</bundles_post_ra>
